<compile_context>
chip_gen: v6e
topology: v6e:2x2x1
jax: 0.10.0
libtpu: 0.0.40
codegen_flags: <defaults>
</compile_context>

<pallas_src>
import functools

import jax
import jax.numpy as jnp
from jax.experimental import pallas as pl
from jax.experimental.pallas import tpu as pltpu

NUM_NEIGHBOR_CELLS = 8
_LANES = 128


# ---------------------------------------------------------------------------
# Kernels
# ---------------------------------------------------------------------------
def _linear_kernel(x_ref, w_ref, b_ref, o_ref, *, apply_sigmoid, scale):
    # x: (tm, K) f32, w: (K, N) bf16, b: (1, N) f32  ->  o: (tm, N) f32
    x = x_ref[...].astype(w_ref.dtype)           # VPU cast, hidden under HBM read
    y = jnp.dot(x, w_ref[...], preferred_element_type=jnp.float32)
    y = y + b_ref[...]
    if apply_sigmoid:
        y = jax.nn.sigmoid(y) * jnp.float32(scale)
    o_ref[...] = y


def _both_kernel(x_ref, w1_ref, b1_ref, w2_ref, b2_ref, s_ref, o_ref, *, scale):
    # One x read, one x@W1; emit both next_state and the sigmoid output head.
    x = x_ref[...].astype(w1_ref.dtype)
    h = jnp.dot(x, w1_ref[...], preferred_element_type=jnp.float32)
    h = h + b1_ref[...]
    s_ref[...] = h
    y = jnp.dot(h.astype(w2_ref.dtype), w2_ref[...],
                preferred_element_type=jnp.float32)
    y = y + b2_ref[...]
    o_ref[...] = jax.nn.sigmoid(y) * jnp.float32(scale)


# ---------------------------------------------------------------------------
# Wrapper helpers
# ---------------------------------------------------------------------------
def _pack_factor(rows, feat):
    """How many cells to pack onto the 128-lane axis (1 = no packing)."""
    if feat < _LANES and _LANES % feat == 0 and rows % (_LANES // feat) == 0:
        return _LANES // feat
    return 1


def _block_diag(w, pack):
    if pack == 1:
        return w
    return jnp.kron(jnp.eye(pack, dtype=w.dtype), w)


def _pick_tile(rows_p, max_tile_rows_p):
    """Row-tile (in packed rows): as big as allowed, bf16-friendly multiple."""
    tm = min(max(1, max_tile_rows_p), rows_p)
    if tm < rows_p:
        if tm >= 16:
            tm -= tm % 16
        else:
            tm = max(8, tm)
    return tm


def _compiler_params():
    # 32 MiB scoped VMEM is safe on v5e/v6e (128 MiB physical) and v7x
    # (64 MiB); actual usage at the default tile sizes is ~10-12 MiB.
    # TODO(synk): for v7x, keep the grid length even so both TensorCores get
    # work when the cell count is large.
    return pltpu.CompilerParams(
        dimension_semantics=("parallel",),
        vmem_limit_bytes=32 * 1024 * 1024,
    )


# ---------------------------------------------------------------------------
# Public forward
# ---------------------------------------------------------------------------
def cell_nn_forward(curr_state, params, *, output=False, num_poss_vals=1,
                    max_tile_rows=4096):
    """Pallas equivalent of CellNN.forward(curr_state, output=output).

    curr_state : (G*G, (NUM_NEIGHBOR_CELLS+1)*S) float32
    params     : dict with w1 (in_dim, S), b1 (S,), w2 (S, O), b2 (O,)
    returns    : (G*G, S) if not output else (G*G, O), float32
    """
    rows, in_dim = curr_state.shape
    w1 = params["w1"].astype(jnp.float32)
    b1 = params["b1"].astype(jnp.float32)
    w2 = params["w2"].astype(jnp.float32)
    b2 = params["b2"].astype(jnp.float32)
    state_size = w1.shape[1]
    assert in_dim == (NUM_NEIGHBOR_CELLS + 1) * state_size

    if output:
        # No nonlinearity between map_state and map_output -> fold the two
        # Linear layers into one matmul.
        w_eff = w1 @ w2
        b_eff = b1 @ w2 + b2
    else:
        w_eff, b_eff = w1, b1
    n_out = w_eff.shape[1]

    pack = _pack_factor(rows, n_out)
    rows_p = rows // pack
    k_dim = pack * in_dim          # lane-dense contracted dim
    n_dense = pack * n_out         # lane-dense output width (128 when packed)

    # Row-major reshape of x is free layout plumbing (no dtype change here;
    # the bf16 cast happens in-kernel so x is read from HBM exactly once).
    x_dense = curr_state.reshape(rows_p, k_dim)
    w_dense = _block_diag(w_eff, pack).astype(jnp.bfloat16)
    b_dense = jnp.tile(b_eff, pack).reshape(1, n_dense).astype(jnp.float32)

    tm = _pick_tile(rows_p, max_tile_rows // pack)
    grid = (pl.cdiv(rows_p, tm),)

    kernel = functools.partial(_linear_kernel, apply_sigmoid=output,
                               scale=float(num_poss_vals))
    cost = pl.CostEstimate(
        flops=2 * rows_p * k_dim * n_dense,
        transcendentals=rows * n_out if output else 0,
        bytes_accessed=(x_dense.size * x_dense.dtype.itemsize
                        + w_dense.size * 2 + b_dense.size * 4
                        + rows_p * n_dense * 4),
    )

    out_dense = pl.pallas_call(
        kernel,
        out_shape=jax.ShapeDtypeStruct((rows_p, n_dense), jnp.float32),
        grid_spec=pltpu.PrefetchScalarGridSpec(
            num_scalar_prefetch=0,
            grid=grid,
            in_specs=[
                pl.BlockSpec((tm, k_dim), lambda i: (i, 0)),
                pl.BlockSpec((k_dim, n_dense), lambda i: (0, 0)),
                pl.BlockSpec((1, n_dense), lambda i: (0, 0)),
            ],
            out_specs=pl.BlockSpec((tm, n_dense), lambda i: (i, 0)),
        ),
        compiler_params=_compiler_params(),
        cost_estimate=cost,
    )(x_dense, w_dense, b_dense)

    return out_dense.reshape(rows, n_out)


def cell_nn_forward_both(curr_state, params, *, num_poss_vals=1,
                         max_tile_rows=4096):
    """Single kernel emitting (next_state, output) — one read of curr_state."""
    rows, in_dim = curr_state.shape
    w1 = params["w1"].astype(jnp.float32)
    b1 = params["b1"].astype(jnp.float32)
    w2 = params["w2"].astype(jnp.float32)
    b2 = params["b2"].astype(jnp.float32)
    state_size = w1.shape[1]
    out_dim = w2.shape[1]
    assert in_dim == (NUM_NEIGHBOR_CELLS + 1) * state_size

    # Pack keyed on state_size: keeps kron(I_pack, W1) small enough that the
    # kernel stays HBM-bound on all of v5e/v6e/v7x.
    pack = _pack_factor(rows, state_size)
    rows_p = rows // pack
    k_dim = pack * in_dim
    s_w = pack * state_size        # 128 when packed
    o_w = pack * out_dim

    x_dense = curr_state.reshape(rows_p, k_dim)
    w1_d = _block_diag(w1, pack).astype(jnp.bfloat16)
    b1_d = jnp.tile(b1, pack).reshape(1, s_w).astype(jnp.float32)
    w2_d = _block_diag(w2, pack).astype(jnp.bfloat16)
    b2_d = jnp.tile(b2, pack).reshape(1, o_w).astype(jnp.float32)

    tm = _pick_tile(rows_p, max_tile_rows // pack)
    grid = (pl.cdiv(rows_p, tm),)

    kernel = functools.partial(_both_kernel, scale=float(num_poss_vals))
    cost = pl.CostEstimate(
        flops=2 * rows_p * k_dim * s_w + 2 * rows_p * s_w * o_w,
        transcendentals=rows * out_dim,
        bytes_accessed=(x_dense.size * x_dense.dtype.itemsize
                        + w1_d.size * 2 + w2_d.size * 2
                        + rows_p * (s_w + o_w) * 4),
    )

    state_d, out_d = pl.pallas_call(
        kernel,
        out_shape=(jax.ShapeDtypeStruct((rows_p, s_w), jnp.float32),
                   jax.ShapeDtypeStruct((rows_p, o_w), jnp.float32)),
        grid_spec=pltpu.PrefetchScalarGridSpec(
            num_scalar_prefetch=0,
            grid=grid,
            in_specs=[
                pl.BlockSpec((tm, k_dim), lambda i: (i, 0)),
                pl.BlockSpec((k_dim, s_w), lambda i: (0, 0)),
                pl.BlockSpec((1, s_w), lambda i: (0, 0)),
                pl.BlockSpec((s_w, o_w), lambda i: (0, 0)),
                pl.BlockSpec((1, o_w), lambda i: (0, 0)),
            ],
            out_specs=[
                pl.BlockSpec((tm, s_w), lambda i: (i, 0)),
                pl.BlockSpec((tm, o_w), lambda i: (i, 0)),
            ],
        ),
        compiler_params=_compiler_params(),
        cost_estimate=cost,
    )(x_dense, w1_d, b1_d, w2_d, b2_d)

    return state_d.reshape(rows, state_size), out_d.reshape(rows, out_dim)


# ---------------------------------------------------------------------------
# Deterministic parameter init (mirrors nn.Linear shapes; synthetic values)
# ---------------------------------------------------------------------------
def init_params(key, state_size, output_dim):
    in_dim = (NUM_NEIGHBOR_CELLS + 1) * state_size
    k1, k2, k3, k4 = jax.random.split(key, 4)
    # nn.Linear weight is (out, in); we store it transposed as (in, out).
    w1 = jax.random.normal(k1, (in_dim, state_size), jnp.float32) * (1.0 / jnp.sqrt(in_dim))
    b1 = jax.random.normal(k2, (state_size,), jnp.float32) * 0.01
    w2 = jax.random.normal(k3, (state_size, output_dim), jnp.float32) * (1.0 / jnp.sqrt(state_size))
    b2 = jax.random.normal(k4, (output_dim,), jnp.float32) * 0.01
    return {"w1": w1, "b1": b1, "w2": w2, "b2": b2}


def reference_forward(x, params, *, output, num_poss_vals):
    h = x @ params["w1"] + params["b1"]
    if output:
        h = jax.nn.sigmoid(h @ params["w2"] + params["b2"]) * num_poss_vals
    return h


if __name__ == "__main__":
    # Small shapes consistent with the module: grid G=16 -> G*G=256 cells,
    # state_size=32, output_dim=8, num_poss_vals=4.
    G = 16
    state_size = 32
    output_dim = 8
    num_poss_vals = 4
    in_dim = (NUM_NEIGHBOR_CELLS + 1) * state_size

    key = jax.random.PRNGKey(0)
    k_x, k_p = jax.random.split(key)
    curr_state = jax.random.normal(k_x, (G * G, in_dim), jnp.float32)
    params = init_params(k_p, state_size, output_dim)

    # jit the wrappers so reshape / weight-prep fuse with the pallas_call.
    fwd_state = jax.jit(functools.partial(cell_nn_forward, output=False,
                                          num_poss_vals=num_poss_vals))
    fwd_out = jax.jit(functools.partial(cell_nn_forward, output=True,
                                        num_poss_vals=num_poss_vals))
    fwd_both = jax.jit(functools.partial(cell_nn_forward_both,
                                         num_poss_vals=num_poss_vals))

    # forward(output=False): next_state only
    next_state = jax.block_until_ready(fwd_state(curr_state, params))

    # forward(output=True): fused linear-linear + sigmoid head
    out = jax.block_until_ready(fwd_out(curr_state, params))

    # fused both-heads kernel (one read of curr_state)
    ns_b, out_b = fwd_both(curr_state, params)
    ns_b = jax.block_until_ready(ns_b)
    out_b = jax.block_until_ready(out_b)

    # correctness check vs. plain-JAX float32 reference (bf16 MXU -> loose tol)
    ref_ns = reference_forward(curr_state, params, output=False,
                               num_poss_vals=num_poss_vals)
    ref_out = reference_forward(curr_state, params, output=True,
                                num_poss_vals=num_poss_vals)

    assert next_state.shape == (G * G, state_size) and next_state.dtype == jnp.float32
    assert out.shape == (G * G, output_dim) and out.dtype == jnp.float32
    assert ns_b.shape == (G * G, state_size) and out_b.shape == (G * G, output_dim)

    assert jnp.allclose(next_state, ref_ns, atol=5e-2, rtol=5e-2)
    assert jnp.allclose(out, ref_out, atol=5e-2, rtol=5e-2)
    assert jnp.allclose(ns_b, ref_ns, atol=5e-2, rtol=5e-2)
    assert jnp.allclose(out_b, ref_out, atol=5e-2, rtol=5e-2)

    print("KERNEL_OK")
</pallas_src>

<mosaic_0001>
module attributes {stable_mosaic.version = 11 : i64} {
  func.func @_linear_kernel(%arg0: i32, %arg1: memref<64x1152xf32, #tpu.memory_space<vmem>>, %arg2: memref<1152x128xbf16, #tpu.memory_space<vmem>>, %arg3: memref<1x128xf32, #tpu.memory_space<vmem>>, %arg4: memref<64x128xf32, #tpu.memory_space<vmem>>) attributes {dimension_semantics = [#tpu.dimension_semantics<parallel>], iteration_bounds = array<i64: 1>, scalar_prefetch = 0 : i64, scratch_operands = 0 : i64, tpu.core_type = #tpu.core_type<tc>, window_params = [{transform_indices = @transform_0, window_bounds = array<i64: 64, 1152>}, {pipeline_mode = #tpu.pipeline_mode<synchronous>, transform_indices = @transform_1, window_bounds = array<i64: 1152, 128>}, {pipeline_mode = #tpu.pipeline_mode<synchronous>, transform_indices = @transform_2, window_bounds = array<i64: 1, 128>}, {transform_indices = @transform_3, window_bounds = array<i64: 64, 128>}]} {
    %c0 = arith.constant 0 : index
    %c0_0 = arith.constant 0 : index
    %0 = vector.load %arg1[%c0, %c0_0] : memref<64x1152xf32, #tpu.memory_space<vmem>>, vector<64x1152xf32>
    %1 = arith.truncf %0 : vector<64x1152xf32> to vector<64x1152xbf16>
    %c0_1 = arith.constant 0 : index
    %c0_2 = arith.constant 0 : index
    %2 = vector.load %arg2[%c0_1, %c0_2] : memref<1152x128xbf16, #tpu.memory_space<vmem>>, vector<1152x128xbf16>
    %cst = arith.constant dense<0.000000e+00> : vector<64x128xf32>
    %3 = tpu.matmul %1, %2, %cst {dimension_numbers = #tpu.dot_dimension_numbers<[1], [0], [0], [1], [0, 0, 1, 1], [], []>} : vector<64x1152xbf16>, vector<1152x128xbf16>, vector<64x128xf32> -> vector<64x128xf32>
    %c0_3 = arith.constant 0 : index
    %c0_4 = arith.constant 0 : index
    %4 = vector.load %arg3[%c0_3, %c0_4] : memref<1x128xf32, #tpu.memory_space<vmem>>, vector<1x128xf32>
    %5 = vector.broadcast %4 : vector<1x128xf32> to vector<64x128xf32>
    %6 = arith.addf %3, %5 : vector<64x128xf32>
    %c0_5 = arith.constant 0 : index
    %c0_6 = arith.constant 0 : index
    %7 = vector.load %arg4[%c0_5, %c0_6] : memref<64x128xf32, #tpu.memory_space<vmem>>, vector<64x128xf32>
    tpu.vector_store %arg4[%c0_5, %c0_6], %6 {strides = array<i32>} : memref<64x128xf32, #tpu.memory_space<vmem>>, vector<64x128xf32>,
    return
  }
  func.func @transform_0(%arg0: i32) -> (i32, i32) {
    %c0_i32 = arith.constant 0 : i32
    %c0_i32_0 = arith.constant 0 : i32
    return %arg0, %c0_i32 : i32, i32
  }
  func.func @transform_1(%arg0: i32) -> (i32, i32) {
    %c0_i32 = arith.constant 0 : i32
    %c0_i32_0 = arith.constant 0 : i32
    %c0_i32_1 = arith.constant 0 : i32
    return %c0_i32, %c0_i32_0 : i32, i32
  }
  func.func @transform_2(%arg0: i32) -> (i32, i32) {
    %c0_i32 = arith.constant 0 : i32
    %c0_i32_0 = arith.constant 0 : i32
    %c0_i32_1 = arith.constant 0 : i32
    return %c0_i32, %c0_i32_0 : i32, i32
  }
  func.func @transform_3(%arg0: i32) -> (i32, i32) {
    %c0_i32 = arith.constant 0 : i32
    %c0_i32_0 = arith.constant 0 : i32
    return %arg0, %c0_i32 : i32, i32
  }
}

</mosaic_0001>

<bundles_post_ra>
// kernel: tile.8
= control target key start
LH: loop header
LB: loop body
LE: loop exit
PB: predicated region body
PF: predicated region fallthrough
CT: control target
= control target key end

     0   :  { %s22_s0 = inlined_call_operand.vmem [shape: f32[32], index: 0, kind: input, shape index: {}]   ;;  %s23_s1 = inlined_call_operand.vmem [shape: f32[4,32], index: 1, kind: output, shape index: {}]  }
   0x1   :  { %v4_v0 = vld [vmem:[%s22_s0] ss:$0 sm:$0xff] }
   0x2   :  { %5 = vst [vmem:[%s23_s1] sm:$0xf] %v4_v0 }

// kernel: tile.9
= control target key start
LH: loop header
LB: loop body
LE: loop exit
PB: predicated region body
PF: predicated region fallthrough
CT: control target
= control target key end

     0   :  { %vm8_vm0 = vcmask 261120   ;;  %s40_s8 = smov 32   ;;  %s41_s9 = smov 64   ;;  %vm14_vm1 = vcmask 1048320   ;;  %vm20_vm2 = vcmask 785920   ;;  %vm26_vm3 = vcmask 523520   ;;  %s58_s0 = inlined_call_operand.vmem [shape: f32[4,32], index: 0, kind: input, shape index: {}]   ;;  %s59_s1 = inlined_call_operand.vmem [shape: f32[1,128], index: 1, kind: output, shape index: {}]  }
   0x1   :  { %v5_v0 = vld [vmem:[%s58_s0] sm:$0xf]  ;;  %s39_s0 = smov 96  }
   0x2   :  { %6 = vst [vmem:[#allocation1] sm:$0xf] %v5_v0 }
   0x9   :  { %v11_v1 = vld [vmem:[#allocation1 + $0x3] sm:$0x1]   ;;  %v23_v2 = vld [vmem:[#allocation1 + $0x1] sm:$0x1]   ;;  %v7_v3 = vld [vmem:[#allocation1] sm:$0x1]  }
   0xa   :  { %12 = vrot.lane.b32.xlu0 %v11_v1, %s39_s0  ;;  %24 = vrot.lane.b32.xlu1 %v23_v2, %s40_s8  ;;  %v17_v4 = vld [vmem:[#allocation1 + $0x2] sm:$0x1]   ;;  %9 = vst.msk [vmem:[#allocation0] sm:$0x1] %vm8_vm0, %v7_v3  }
   0xe   :  { %18 = vrot.lane.b32.xlu0 %v17_v4, %s41_s9 }
  0x7c   :  { %v13_v5 = vpop.permute.xlu0 %12   ;;  %v25_v6 = vpop.permute.xlu1 %24  }
  0x7d   :  { %15 = vst.msk [vmem:[#allocation0] sm:$0x1] %vm14_vm1, %v13_v5  }
  0x80   :  { %v19_v7 = vpop.permute.xlu0 %18  }
  0x81   :  { %21 = vst.msk [vmem:[#allocation0] sm:$0x1] %vm20_vm2, %v19_v7  }
  0x82   :  { %27 = vst.msk [vmem:[#allocation0] sm:$0x1] %vm26_vm3, %v25_v6  }
  0x89   :  { %v32_v8 = vld [vmem:[#allocation0] sm:$0x1] }
  0x8a   :  { %35 = vst [vmem:[%s59_s1] sm:$0x1] %v32_v8 }

// kernel: cell_nn_forward.1
= control target key start
LH: loop header
LB: loop body
LE: loop exit
PB: predicated region body
PF: predicated region fallthrough
CT: control target
= control target key end

     0   :  { %s1942_s1 = inlined_call_operand.vmem [shape: bf16[1152,128], index: 1, kind: input, shape index: {}]   ;;  %s1943_s0 = inlined_call_operand.vmem [shape: f32[64,1152], index: 0, kind: input, shape index: {}]   ;;  %s1944_s2 = inlined_call_operand.vmem [shape: f32[1,128], index: 2, kind: input, shape index: {}]   ;;  %s1945_s3 = inlined_call_operand.vmem [shape: f32[64,128], index: 3, kind: output, shape index: {}]  }
   0x1   :  { %v1328_v0 = vld [vmem:[%s1942_s1 + $0x78] sm:$0xff]   ;;  %v1332_v4 = vld [vmem:[%s1942_s1 + $0x70] sm:$0xff]   ;;  %v1336_v8 = vld [vmem:[%s1942_s1 + $0x68] sm:$0xff]  }
   0x2   :  { %v1329_v1 = vld [vmem:[%s1942_s1 + $0xf8] sm:$0xff]   ;;  %1116 = vmatprep.subr.bf16.mxu0 %v1328_v0  ;;  %v1333_v5 = vld [vmem:[%s1942_s1 + $0xf0] sm:$0xff]   ;;  %v1337_v9 = vld [vmem:[%s1942_s1 + $0xe8] sm:$0xff]  }
   0x3   :  { %v1330_v2 = vld [vmem:[%s1942_s1 + $0x38] sm:$0xff]   ;;  %1156 = vmatprep.subr.bf16.mxu1 %v1329_v1  ;;  %v1334_v6 = vld [vmem:[%s1942_s1 + $0x30] sm:$0xff]   ;;  %v1338_v10 = vld [vmem:[%s1942_s1 + $0x28] sm:$0xff]  }
   0x4   :  { %v1331_v3 = vld [vmem:[%s1942_s1 + $0xb8] sm:$0xff]   ;;  %1117 = vmatpush3.bf16.msra.mxu0 %v1330_v2  ;;  %v1335_v7 = vld [vmem:[%s1942_s1 + $0xb0] sm:$0xff]   ;;  %v1339_v11 = vld [vmem:[%s1942_s1 + $0xa8] sm:$0xff]  }
   0x5   :  { %1157 = vmatpush3.bf16.msra.mxu1 %v1331_v3  ;;  %1118 = vmatprep.subr.bf16.mxu0 %v1332_v4  ;;  %v1340_v12 = vld [vmem:[%s1942_s1 + $0x60] sm:$0xff]   ;;  %v1344_v16 = vld [vmem:[%s1942_s1 + $0x58] sm:$0xff]   ;;  %v1348_v20 = vld [vmem:[%s1942_s1 + $0x50] sm:$0xff]  }
   0x6   :  { %1158 = vmatprep.subr.bf16.mxu1 %v1333_v5  ;;  %v1341_v13 = vld [vmem:[%s1942_s1 + $0xe0] sm:$0xff]   ;;  %v1345_v17 = vld [vmem:[%s1942_s1 + $0xd8] sm:$0xff]   ;;  %v1349_v21 = vld [vmem:[%s1942_s1 + $0xd0] sm:$0xff]  }
   0x7   :  { %v1342_v14 = vld [vmem:[%s1942_s1 + $0x20] sm:$0xff]   ;;  %v1346_v18 = vld [vmem:[%s1942_s1 + $0x18] sm:$0xff]   ;;  %v1350_v22 = vld [vmem:[%s1942_s1 + $0x10] sm:$0xff]  }
   0x8   :  { %1119 = vmatpush3.bf16.msra.mxu0 %v1334_v6  ;;  %v1343_v15 = vld [vmem:[%s1942_s1 + $0xa0] sm:$0xff]   ;;  %v1347_v19 = vld [vmem:[%s1942_s1 + $0x98] sm:$0xff]   ;;  %v1351_v23 = vld [vmem:[%s1942_s1 + $0x90] sm:$0xff]  }
   0x9   :  { %1159 = vmatpush3.bf16.msra.mxu1 %v1335_v7  ;;  %1120 = vmatprep.subr.bf16.mxu0 %v1336_v8  ;;  %v1352_v24 = vld [vmem:[%s1942_s1 + $0x48] sm:$0xff]   ;;  %v1356_v28 = vld [vmem:[%s1942_s1 + $0x40] sm:$0xff]   ;;  %v25_v33 = vld [vmem:[%s1943_s0 + $0x50] sm:$0xff] }
   0xa   :  { %1160 = vmatprep.subr.bf16.mxu1 %v1337_v9  ;;  %v1353_v25 = vld [vmem:[%s1942_s1 + $0xc8] sm:$0xff]   ;;  %v1357_v29 = vld [vmem:[%s1942_s1 + $0xc0] sm:$0xff]   ;;  %v18_v34 = vld [vmem:[%s1943_s0 + $0x18] sm:$0xff] }
   0xb   :  { %v1354_v26 = vld [vmem:[%s1942_s1 + $0x8] sm:$0xff]   ;;  %v1358_v30 = vld [vmem:[%s1942_s1] sm:$0xff]   ;;  %v17_v41 = vld [vmem:[%s1943_s0 + $0x10] sm:$0xff] }
   0xc   :  { %1121 = vmatpush3.bf16.msra.mxu0 %v1338_v10  ;;  %v1355_v27 = vld [vmem:[%s1942_s1 + $0x88] sm:$0xff]   ;;  %v1359_v31 = vld [vmem:[%s1942_s1 + $0x80] sm:$0xff]   ;;  %v26_v42 = vld [vmem:[%s1943_s0 + $0x58] sm:$0xff] }
   0xd   :  { %1161 = vmatpush3.bf16.msra.mxu1 %v1339_v11  ;;  %1122 = vmatprep.subr.bf16.mxu0 %v1340_v12  ;;  %v16_v32 = vld [vmem:[%s1943_s0 + $0x8] sm:$0xff]  ;;  %v27_v36 = vld [vmem:[%s1943_s0 + $0x60] sm:$0xff]  ;;  %v89_v43 = vpack.c.bf16 %v26_v42, %v17_v41  ;;  %v1360_v44 = vld [vmem:[%s1942_s1 + $0x178] sm:$0xff]  }
   0xe   :  { %1162 = vmatprep.subr.bf16.mxu1 %v1341_v13  ;;  %v88_v35 = vpack.c.bf16 %v25_v33, %v16_v32  ;;  %v15_v37 = vld [vmem:[%s1943_s0] sm:$0xff]  ;;  %v24_v38 = vld [vmem:[%s1943_s0 + $0x48] sm:$0xff]  ;;  %v90_v39 = vpack.c.bf16 %v27_v36, %v18_v34  ;;  %v1361_v45 = vld [vmem:[%s1942_s1 + $0x1f8] sm:$0xff]  }
   0xf   :  { %v87_v40 = vpack.c.bf16 %v24_v38, %v15_v37  ;;  %v1362_v46 = vld [vmem:[%s1942_s1 + $0x138] sm:$0xff]   ;;  %v1364_v48 = vld [vmem:[%s1942_s1 + $0x170] sm:$0xff]   ;;  %v43_v53 = vld [vmem:[%s1943_s0 + $0xe0] sm:$0xff] }
  0x10   :  { %1123 = vmatpush3.bf16.msra.mxu0 %v1342_v14  ;;  %738 = vmatprep.mubr.bf16.mxu0 %v88_v35  ;;  %v1363_v47 = vld [vmem:[%s1942_s1 + $0x1b8] sm:$0xff]   ;;  %v1365_v49 = vld [vmem:[%s1942_s1 + $0x1f0] sm:$0xff]   ;;  %v36_v54 = vld [vmem:[%s1943_s0 + $0xa8] sm:$0xff] }
  0x11   :  { %1163 = vmatpush3.bf16.msra.mxu1 %v1343_v15  ;;  %1124 = vmatprep.subr.bf16.mxu0 %v1344_v16  ;;  %v1366_v50 = vld [vmem:[%s1942_s1 + $0x130] sm:$0xff]   ;;  %v34_v52 = vld [vmem:[%s1943_s0 + $0x98] sm:$0xff]  ;;  %v35_v60 = vld [vmem:[%s1943_s0 + $0xa0] sm:$0xff] }
  0x12   :  { %1164 = vmatprep.subr.bf16.mxu1 %v1345_v17  ;;  %803 = vmatprep.mubr.bf16.mxu1 %v90_v39  ;;  %v1367_v51 = vld [vmem:[%s1942_s1 + $0x1b0] sm:$0xff]   ;;  %v97_v56 = vpack.c.bf16 %v43_v53, %v34_v52  ;;  %v42_v59 = vld [vmem:[%s1943_s0 + $0xd8] sm:$0xff]  ;;  %v44_v62 = vld [vmem:[%s1943_s0 + $0xe8] sm:$0xff] }
  0x13   :  { %v45_v55 = vld [vmem:[%s1943_s0 + $0xf0] sm:$0xff]  ;;  %v98_v63 = vpack.c.bf16 %v44_v62, %v35_v60  ;;  %v1368_v0 = vld [vmem:[%s1942_s1 + $0x168] sm:$0xff]   ;;  %v1372_v4 = vld [vmem:[%s1942_s1 + $0x160] sm:$0xff]  }
  0x14   :  { %1125 = vmatpush3.bf16.msra.mxu0 %v1346_v18  ;;  %v99_v57 = vpack.c.bf16 %v45_v55, %v36_v54  ;;  %v33_v58 = vld [vmem:[%s1943_s0 + $0x90] sm:$0xff]  ;;  %v1369_v1 = vld [vmem:[%s1942_s1 + $0x1e8] sm:$0xff]   ;;  %v1373_v5 = vld [vmem:[%s1942_s1 + $0x1e0] sm:$0xff]  }
  0x15   :  { %1165 = vmatpush3.bf16.msra.mxu1 %v1347_v19  ;;  %1126 = vmatprep.subr.bf16.mxu0 %v1348_v20  ;;  %v96_v61 = vpack.c.bf16 %v42_v59, %v33_v58  ;;  %v1370_v2 = vld [vmem:[%s1942_s1 + $0x128] sm:$0xff]   ;;  %v1374_v6 = vld [vmem:[%s1942_s1 + $0x120] sm:$0xff]   ;;  %v61_v9 = vld [vmem:[%s1943_s0 + $0x170] sm:$0xff] }
  0x16   :  { %1166 = vmatprep.subr.bf16.mxu1 %v1349_v21  ;;  %v1371_v3 = vld [vmem:[%s1942_s1 + $0x1a8] sm:$0xff]   ;;  %v1375_v7 = vld [vmem:[%s1942_s1 + $0x1a0] sm:$0xff]   ;;  %v54_v11 = vld [vmem:[%s1943_s0 + $0x138] sm:$0xff] }
  0x17   :  { %v52_v8 = vld [vmem:[%s1943_s0 + $0x128] sm:$0xff]  ;;  %v63_v12 = vld [vmem:[%s1943_s0 + $0x180] sm:$0xff]  ;;  %v53_v16 = vld [vmem:[%s1943_s0 + $0x130] sm:$0xff] }
  0x18   :  { %1127 = vmatpush3.bf16.msra.mxu0 %v1350_v22  ;;  %v106_v10 = vpack.c.bf16 %v61_v9, %v52_v8  ;;  %v51_v13 = vld [vmem:[%s1943_s0 + $0x120] sm:$0xff]  ;;  %v108_v14 = vpack.c.bf16 %v63_v12, %v54_v11  ;;  %v60_v15 = vld [vmem:[%s1943_s0 + $0x168] sm:$0xff]  ;;  %v62_v17 = vld [vmem:[%s1943_s0 + $0x178] sm:$0xff] }
  0x19   :  { %1167 = vmatpush3.bf16.msra.mxu1 %v1351_v23  ;;  %1128 = vmatprep.subr.bf16.mxu0 %v1352_v24  ;;  %v105_v18 = vpack.c.bf16 %v60_v15, %v51_v13  ;;  %v107_v19 = vpack.c.bf16 %v62_v17, %v53_v16  ;;  %v1376_v20 = vld [vmem:[%s1942_s1 + $0x158] sm:$0xff]   ;;  %v1380_v24 = vld [vmem:[%s1942_s1 + $0x150] sm:$0xff]   ;;  %v71_v37 = vld [vmem:[%s1943_s0 + $0x1c0] sm:$0xff] }
  0x1a   :  { %1168 = vmatprep.subr.bf16.mxu1 %v1353_v25  ;;  %v1377_v21 = vld [vmem:[%s1942_s1 + $0x1d8] sm:$0xff]   ;;  %v1381_v25 = vld [vmem:[%s1942_s1 + $0x1d0] sm:$0xff]   ;;  %v80_v38 = vld [vmem:[%s1943_s0 + $0x208] sm:$0xff] }
  0x1b   :  { %v1378_v22 = vld [vmem:[%s1942_s1 + $0x118] sm:$0xff]   ;;  %v81_v32 = vld [vmem:[%s1943_s0 + $0x210] sm:$0xff]  ;;  %v116_v39 = vpack.c.bf16 %v80_v38, %v71_v37  ;;  %v1385_v41 = vld [vmem:[%s1942_s1 + $0x1c8] sm:$0xff]  }
  0x1c   :  { %1129 = vmatpush3.bf16.msra.mxu0 %v1354_v26  ;;  %v1379_v23 = vld [vmem:[%s1942_s1 + $0x198] sm:$0xff]   ;;  %v1382_v26 = vld [vmem:[%s1942_s1 + $0x110] sm:$0xff]   ;;  %v1386_v42 = vld [vmem:[%s1942_s1 + $0x108] sm:$0xff]  }
  0x1d   :  { %1169 = vmatpush3.bf16.msra.mxu1 %v1355_v27  ;;  %1130 = vmatprep.subr.bf16.mxu0 %v1356_v28  ;;  %v1383_v27 = vld [vmem:[%s1942_s1 + $0x190] sm:$0xff]   ;;  %v70_v28 = vld [vmem:[%s1943_s0 + $0x1b8] sm:$0xff]  ;;  %v19_v54 = vld [vmem:[%s1943_s0 + $0x20] sm:$0xff] }
  0x1e   :  { %1170 = vmatprep.subr.bf16.mxu1 %v1357_v29  ;;  %v79_v29 = vld [vmem:[%s1943_s0 + $0x200] sm:$0xff]  ;;  %v69_v33 = vld [vmem:[%s1943_s0 + $0x1b0] sm:$0xff]  ;;  %v78_v34 = vld [vmem:[%s1943_s0 + $0x1f8] sm:$0xff] }
  0x1f   :  { %v114_v36 = vpack.c.bf16 %v78_v34, %v69_v33  ;;  %v28_v55 = vld [vmem:[%s1943_s0 + $0x68] sm:$0xff]  ;;  %v30_v58 = vld [vmem:[%s1943_s0 + $0x78] sm:$0xff]  ;;  %v65_v12 = vld [vmem:[%s1943_s0 + $0x190] sm:$0xff] }
  0x20   :  { %1131 = vmatpush3.bf16.msra.mxu0 %v1358_v30  ;;  %v72_v30 = vld [vmem:[%s1943_s0 + $0x1c8] sm:$0xff]  ;;  %v1392_v60 = vld [vmem:[%s1942_s1 + $0x238] sm:$0xff]   ;;  %v67_v15 = vld [vmem:[%s1943_s0 + $0x1a0] sm:$0xff] }
  0x21   :  { %1171 = vmatpush3.bf16.msra.mxu1 %v1359_v31  ;;  %1196 = vmatprep.subr.bf16.mxu0 %v1360_v44  ;;  %v115_v31 = vpack.c.bf16 %v79_v29, %v70_v28  ;;  %v117_v35 = vpack.c.bf16 %v81_v32, %v72_v30  ;;  %v1388_v44 = vld [vmem:[%s1942_s1 + $0x140] sm:$0xff]   ;;  %v38_v62 = vld [vmem:[%s1943_s0 + $0xb8] sm:$0xff]  ;;  %v1394_v8 = vld [vmem:[%s1942_s1 + $0x228] sm:$0xff]  }
  0x22   :  { %1236 = vmatprep.subr.bf16.mxu1 %v1361_v45  ;;  %v1389_v45 = vld [vmem:[%s1942_s1 + $0x1c0] sm:$0xff]   ;;  %v56_v11 = vld [vmem:[%s1943_s0 + $0x148] sm:$0xff]  ;;  %v58_v13 = vld [vmem:[%s1943_s0 + $0x158] sm:$0xff] }
  0x23   :  { %739 = vmatmul.mubr.bf16.vlgmr.msra.gmra.mxu0 %v87_v40  ;;  %v1384_v40 = vld [vmem:[%s1942_s1 + $0x148] sm:$0xff]   ;;  %v1395_v16 = vld [vmem:[%s1942_s1 + $0x220] sm:$0xff]   ;;  %v112_v17 = vpack.c.bf16 %v67_v15, %v58_v13  ;;  %v73_v32 = vld [vmem:[%s1943_s0 + $0x1d0] sm:$0xff] }
  0x24   :  { %804 = vmatmul.mubr.bf16.vlgmr.msra.gmra.mxu1 %v89_v43  ;;  %1197 = vmatpush3.bf16.msra.mxu0 %v1362_v46  ;;  %v1387_v43 = vld [vmem:[%s1942_s1 + $0x188] sm:$0xff]   ;;  %v1390_v46 = vld [vmem:[%s1942_s1 + $0x100] sm:$0xff]   ;;  %v82_v33 = vld [vmem:[%s1943_s0 + $0x218] sm:$0xff] }
  0x25   :  { %1237 = vmatpush3.bf16.msra.mxu1 %v1363_v47  ;;  %1198 = vmatprep.subr.bf16.mxu0 %v1364_v48  ;;  %v1391_v47 = vld [vmem:[%s1942_s1 + $0x180] sm:$0xff]   ;;  %v20_v48 = vld [vmem:[%s1943_s0 + $0x28] sm:$0xff] }
  0x26   :  { %1238 = vmatprep.subr.bf16.mxu1 %v1365_v49  ;;  %746 = vmatprep.mubr.bf16.mxu0 %v97_v56  ;;  %v29_v49 = vld [vmem:[%s1943_s0 + $0x70] sm:$0xff]  ;;  %v75_v34 = vld [vmem:[%s1943_s0 + $0x1e0] sm:$0xff]  ;;  %v32_v37 = vld [vmem:[%s1943_s0 + $0x88] sm:$0xff] }
  0x27   :  { %811 = vmatprep.mubr.bf16.mxu1 %v99_v57  ;;  %v92_v52 = vpack.c.bf16 %v29_v49, %v20_v48  ;;  %v21_v56 = vld [vmem:[%s1943_s0 + $0x30] sm:$0xff]  ;;  %v91_v57 = vpack.c.bf16 %v28_v55, %v19_v54  ;;  %v1398_v38 = vld [vmem:[%s1942_s1 + $0x208] sm:$0xff]   ;;  %v86_v49 = vld [vmem:[%s1943_s0 + $0x238] sm:$0xff] }
  0x28   :  { %1199 = vmatpush3.bf16.msra.mxu0 %v1366_v50  ;;  %v22_v50 = vld [vmem:[%s1943_s0 + $0x38] sm:$0xff]  ;;  %v93_v59 = vpack.c.bf16 %v30_v58, %v21_v56  ;;  %v77_v48 = vld [vmem:[%s1943_s0 + $0x1f0] sm:$0xff] }
  0x29   :  { %1239 = vmatpush3.bf16.msra.mxu1 %v1367_v51  ;;  %1200 = vmatprep.subr.bf16.mxu0 %v1368_v0  ;;  %v31_v51 = vld [vmem:[%s1943_s0 + $0x80] sm:$0xff] }
  0x2a   :  { %1240 = vmatprep.subr.bf16.mxu1 %v1369_v1  ;;  %v94_v53 = vpack.c.bf16 %v31_v51, %v22_v50  ;;  %v40_v1 = vld [vmem:[%s1943_s0 + $0xc8] sm:$0xff]  ;;  %v122_v51 = vpack.c.bf16 %v86_v49, %v77_v48 }
  0x2b   :  { %747 = vmatmul.mubr.bf16.gmra.mxu0 %v96_v61  ;;  %v1393_v61 = vld [vmem:[%s1942_s1 + $0x230] sm:$0xff]  }
  0x2c   :  { %812 = vmatmul.mubr.bf16.gmra.mxu1 %v98_v63  ;;  %1201 = vmatpush3.bf16.msra.mxu0 %v1370_v2  ;;  %v47_v63 = vld [vmem:[%s1943_s0 + $0x100] sm:$0xff]  ;;  %v49_v2 = vld [vmem:[%s1943_s0 + $0x110] sm:$0xff] }
  0x2d   :  { %1241 = vmatpush3.bf16.msra.mxu1 %v1371_v3  ;;  %1202 = vmatprep.subr.bf16.mxu0 %v1372_v4  ;;  %v101_v0 = vpack.c.bf16 %v47_v63, %v38_v62  ;;  %v37_v3 = vld [vmem:[%s1943_s0 + $0xb0] sm:$0xff]  ;;  %v103_v4 = vpack.c.bf16 %v49_v2, %v40_v1 }
  0x2e   :  { %1242 = vmatprep.subr.bf16.mxu1 %v1373_v5  ;;  %754 = vmatprep.mubr.bf16.mxu0 %v106_v10  ;;  %v46_v5 = vld [vmem:[%s1943_s0 + $0xf8] sm:$0xff] }
  0x2f   :  { %819 = vmatprep.mubr.bf16.mxu1 %v108_v14  ;;  %v100_v9 = vpack.c.bf16 %v46_v5, %v37_v3  ;;  %v110_v14 = vpack.c.bf16 %v65_v12, %v56_v11 }
  0x30   :  { %1203 = vmatpush3.bf16.msra.mxu0 %v1374_v6  ;;  %v39_v6 = vld [vmem:[%s1943_s0 + $0xc0] sm:$0xff] }
  0x31   :  { %1243 = vmatpush3.bf16.msra.mxu1 %v1375_v7  ;;  %1204 = vmatprep.subr.bf16.mxu0 %v1376_v20  ;;  %v48_v7 = vld [vmem:[%s1943_s0 + $0x108] sm:$0xff]  ;;  %v57_v20 = vld [vmem:[%s1943_s0 + $0x150] sm:$0xff] }
  0x32   :  { %1244 = vmatprep.subr.bf16.mxu1 %v1377_v21  ;;  %v102_v10 = vpack.c.bf16 %v48_v7, %v39_v6  ;;  %v66_v21 = vld [vmem:[%s1943_s0 + $0x198] sm:$0xff] }
  0x33   :  { %755 = vmatmul.mubr.bf16.gmra.mxu0 %v105_v18  ;;  %v55_v18 = vld [vmem:[%s1943_s0 + $0x140] sm:$0xff]  ;;  %v111_v28 = vpack.c.bf16 %v66_v21, %v57_v20 }
  0x34   :  { %820 = vmatmul.mubr.bf16.gmra.mxu1 %v107_v19  ;;  %1205 = vmatpush3.bf16.msra.mxu0 %v1378_v22  ;;  %v64_v19 = vld [vmem:[%s1943_s0 + $0x188] sm:$0xff]  ;;  %v74_v22 = vld [vmem:[%s1943_s0 + $0x1d8] sm:$0xff] }
  0x35   :  { %1245 = vmatpush3.bf16.msra.mxu1 %v1379_v23  ;;  %1206 = vmatprep.subr.bf16.mxu0 %v1380_v24  ;;  %v83_v23 = vld [vmem:[%s1943_s0 + $0x220] sm:$0xff]  ;;  %v1396_v24 = vld [vmem:[%s1942_s1 + $0x218] sm:$0xff]  }
  0x36   :  { %1246 = vmatprep.subr.bf16.mxu1 %v1381_v25  ;;  %762 = vmatprep.mubr.bf16.mxu0 %v115_v31  ;;  %v76_v25 = vld [vmem:[%s1943_s0 + $0x1e8] sm:$0xff]  ;;  %v119_v29 = vpack.c.bf16 %v83_v23, %v74_v22  ;;  %v1397_v31 = vld [vmem:[%s1942_s1 + $0x210] sm:$0xff]  }
  0x37   :  { %827 = vmatprep.mubr.bf16.mxu1 %v117_v35  ;;  %v84_v35 = vld [vmem:[%s1943_s0 + $0x228] sm:$0xff] }
  0x38   :  { %1207 = vmatpush3.bf16.msra.mxu0 %v1382_v26  ;;  %v85_v26 = vld [vmem:[%s1943_s0 + $0x230] sm:$0xff] }
  0x39   :  { %1247 = vmatpush3.bf16.msra.mxu1 %v1383_v27  ;;  %1208 = vmatprep.subr.bf16.mxu0 %v1384_v40  ;;  %v109_v27 = vpack.c.bf16 %v64_v19, %v55_v18  ;;  %v121_v30 = vpack.c.bf16 %v85_v26, %v76_v25  ;;  %v68_v40 = vld [vmem:[%s1943_s0 + $0x1a8] sm:$0xff] }
  0x3a   :  { %1248 = vmatprep.subr.bf16.mxu1 %v1385_v41  ;;  %v118_v41 = vpack.c.bf16 %v82_v33, %v73_v32 }
  0x3b   :  { %763 = vmatmul.mubr.bf16.gmra.mxu0 %v114_v36  ;;  %v23_v36 = vld [vmem:[%s1943_s0 + $0x40] sm:$0xff] }
  0x3c   :  { %828 = vmatmul.mubr.bf16.gmra.mxu1 %v116_v39  ;;  %1209 = vmatpush3.bf16.msra.mxu0 %v1386_v42  ;;  %v59_v39 = vld [vmem:[%s1943_s0 + $0x160] sm:$0xff]  ;;  %v120_v42 = vpack.c.bf16 %v84_v35, %v75_v34 }
  0x3d   :  { %1249 = vmatpush3.bf16.msra.mxu1 %v1387_v43  ;;  %1210 = vmatprep.subr.bf16.mxu0 %v1388_v44  ;;  %v95_v43 = vpack.c.bf16 %v32_v37, %v23_v36  ;;  %v113_v44 = vpack.c.bf16 %v68_v40, %v59_v39  ;;  %v1043_v37 = vld [vmem:[%s1944_s2] ss:$0 sm:$0xff] }
  0x3e   :  { %1250 = vmatprep.subr.bf16.mxu1 %v1389_v45  ;;  %868 = vmatprep.mubr.bf16.mxu0 %v92_v52  ;;  %v1399_v45 = vld [vmem:[%s1942_s1 + $0x200] sm:$0xff]  }
  0x3f   :  { %933 = vmatprep.mubr.bf16.mxu1 %v94_v53 }
  0x40   :  { %1211 = vmatpush3.bf16.msra.mxu0 %v1390_v46  ;;  %v41_v46 = vld [vmem:[%s1943_s0 + $0xd0] sm:$0xff] }
  0x41   :  { %1251 = vmatpush3.bf16.msra.mxu1 %v1391_v47  ;;  %1288 = vmatprep.subr.bf16.mxu0 %v1392_v60  ;;  %v50_v47 = vld [vmem:[%s1943_s0 + $0x118] sm:$0xff] }
  0x42   :  { %1312 = vmatprep.subr.bf16.mxu1 %v1392_v60  ;;  %v104_v50 = vpack.c.bf16 %v50_v47, %v41_v46 }
  0x43   :  { %869 = vmatmul.mubr.bf16.vlgmr.msra.gmra.mxu0 %v91_v57 }
  0x44   :  { %934 = vmatmul.mubr.bf16.vlgmr.msra.gmra.mxu1 %v93_v59  ;;  %1289 = vmatpush3.bf16.msra.mxu0 %v1392_v60 }
  0x45   :  { %1320 = vmatpush3.bf16.msra.mxu1 %v1392_v60  ;;  %1290 = vmatprep.subr.bf16.mxu0 %v1393_v61 }
  0x46   :  { %1313 = vmatprep.subr.bf16.mxu1 %v1393_v61  ;;  %876 = vmatprep.mubr.bf16.mxu0 %v101_v0 }
  0x47   :  { %941 = vmatprep.mubr.bf16.mxu1 %v103_v4 }
  0x48   :  { %1291 = vmatpush3.bf16.msra.mxu0 %v1393_v61 }
  0x49   :  { %1321 = vmatpush3.bf16.msra.mxu1 %v1393_v61  ;;  %1292 = vmatprep.subr.bf16.mxu0 %v1394_v8 }
  0x4a   :  { %1314 = vmatprep.subr.bf16.mxu1 %v1394_v8 }
  0x4b   :  { %877 = vmatmul.mubr.bf16.gmra.mxu0 %v100_v9 }
  0x4c   :  { %942 = vmatmul.mubr.bf16.gmra.mxu1 %v102_v10  ;;  %884 = vmatprep.mubr.bf16.mxu0 %v110_v14 }
  0x4d   :  { %1293 = vmatpush3.bf16.msra.mxu0 %v1394_v8  ;;  %949 = vmatprep.mubr.bf16.mxu1 %v112_v17 }
  0x4e   :  { %1322 = vmatpush3.bf16.msra.mxu1 %v1394_v8  ;;  %1294 = vmatprep.subr.bf16.mxu0 %v1395_v16 }
  0x4f   :  { %1315 = vmatprep.subr.bf16.mxu1 %v1395_v16 }
  0x51   :  { %1295 = vmatpush3.bf16.msra.mxu0 %v1395_v16 }
  0x52   :  { %1323 = vmatpush3.bf16.msra.mxu1 %v1395_v16  ;;  %1296 = vmatprep.subr.bf16.mxu0 %v1396_v24 }
  0x53   :  { %885 = vmatmul.mubr.bf16.gmra.mxu0 %v109_v27  ;;  %1316 = vmatprep.subr.bf16.mxu1 %v1396_v24 }
  0x54   :  { %950 = vmatmul.mubr.bf16.gmra.mxu1 %v111_v28  ;;  %892 = vmatprep.mubr.bf16.mxu0 %v119_v29 }
  0x55   :  { %1297 = vmatpush3.bf16.msra.mxu0 %v1396_v24  ;;  %957 = vmatprep.mubr.bf16.mxu1 %v121_v30 }
  0x56   :  { %1324 = vmatpush3.bf16.msra.mxu1 %v1396_v24  ;;  %1298 = vmatprep.subr.bf16.mxu0 %v1397_v31 }
  0x57   :  { %1317 = vmatprep.subr.bf16.mxu1 %v1397_v31 }
  0x59   :  { %1299 = vmatpush3.bf16.msra.mxu0 %v1397_v31 }
  0x5a   :  { %1325 = vmatpush3.bf16.msra.mxu1 %v1397_v31  ;;  %1300 = vmatprep.subr.bf16.mxu0 %v1398_v38 }
  0x5b   :  { %893 = vmatmul.mubr.bf16.gmra.mxu0 %v118_v41  ;;  %1318 = vmatprep.subr.bf16.mxu1 %v1398_v38 }
  0x5c   :  { %958 = vmatmul.mubr.bf16.gmra.mxu1 %v120_v42  ;;  %1304 = vmatprep.mubr.bf16.mxu0 %v95_v43 }
  0x5d   :  { %1301 = vmatpush3.bf16.msra.mxu0 %v1398_v38  ;;  %1308 = vmatprep.mubr.bf16.mxu1 %v113_v44 }
  0x5e   :  { %1326 = vmatpush3.bf16.msra.mxu1 %v1398_v38  ;;  %1302 = vmatprep.subr.bf16.mxu0 %v1399_v45 }
  0x5f   :  { %1319 = vmatprep.subr.bf16.mxu1 %v1399_v45 }
  0x61   :  { %1303 = vmatpush3.bf16.msra.mxu0 %v1399_v45 }
  0x62   :  { %1327 = vmatpush3.bf16.msra.mxu1 %v1399_v45 }
  0x64   :  { %1305 = vmatmul.mubr.bf16.vlgmr.msra.gmra.mxu0 %v104_v50 }
  0x65   :  { %1309 = vmatmul.mubr.bf16.vlgmr.msra.gmra.mxu1 %v122_v51 }
  0xe3   :  { %v1132_v52 = vpop.f32.mrf.mxu0 }
  0xe4   :  { %v1172_v53 = vpop.f32.mrf.mxu1 }
  0xe5   :  { %v1133_v54 = vpop.f32.mrf.mxu0 }
  0xe6   :  { %v1173_v55 = vpop.f32.mrf.mxu1  ;;  %v1134_v35 = vadd.f32 %v1133_v54, %v1132_v52 }
  0xe7   :  { %v1135_v56 = vpop.f32.mrf.mxu0  ;;  %v1174_v48 = vadd.f32 %v1173_v55, %v1172_v53 }
  0xe8   :  { %v1852_v57 = vpop.f32.mrf.mxu1  ;;  %v741_v42 = vadd.f32 %v1134_v35, %v1043_v37 }
  0xe9   :  { %v1136_v58 = vpop.f32.mrf.mxu0 }
  0xea   :  { %v1854_v59 = vpop.f32.mrf.mxu1  ;;  %v1137_v49 = vadd.f32 %v1136_v58, %v1135_v56 }
  0xeb   :  { %v1138_v60 = vpop.f32.mrf.mxu0 }
  0xec   :  { %v1856_v61 = vpop.f32.mrf.mxu1  ;;  %v744_v53 = vadd.f32 %v1137_v49, %v1043_v37 }
  0xed   :  { %v1139_v62 = vpop.f32.mrf.mxu0 }
  0xee   :  { %v1179_v63 = vpop.f32.mrf.mxu1  ;;  %v1140_v40 = vadd.f32 %v1139_v62, %v1138_v60  ;;  %v1177_v60 = vadd.f32 %v1854_v59, %v1852_v57 }
  0xef   :  { %v1141_v0 = vpop.f32.mrf.mxu0  ;;  %v1180_v62 = vadd.f32 %v1179_v63, %v1856_v61 }
  0xf0   :  { %v1858_v1 = vpop.f32.mrf.mxu1  ;;  %v749_v51 = vadd.f32 %v1140_v40, %v1043_v37 }
  0xf1   :  { %v1142_v2 = vpop.f32.mrf.mxu0 }
  0xf2   :  { %v1182_v3 = vpop.f32.mrf.mxu1  ;;  %v1143_v43 = vadd.f32 %v1142_v2, %v1141_v0 }
  0xf3   :  { %v1144_v4 = vpop.f32.mrf.mxu0  ;;  %v1183_v55 = vadd.f32 %v1182_v3, %v1858_v1 }
  0xf4   :  { %v1860_v5 = vpop.f32.mrf.mxu1 }
  0xf5   :  { %v1145_v6 = vpop.f32.mrf.mxu0 }
  0xf6   :  { %v1862_v7 = vpop.f32.mrf.mxu1  ;;  %v1146_v46 = vadd.f32 %v1145_v6, %v1144_v4 }
  0xf7   :  { %v1147_v8 = vpop.f32.mrf.mxu0 }
  0xf8   :  { %v1864_v9 = vpop.f32.mrf.mxu1  ;;  %v757_v0 = vadd.f32 %v1146_v46, %v1043_v37 }
  0xf9   :  { %v1148_v10 = vpop.f32.mrf.mxu0 }
  0xfa   :  { %v1866_v11 = vpop.f32.mrf.mxu1  ;;  %v1149_v56 = vadd.f32 %v1148_v10, %v1147_v8 }
  0xfb   :  { %v1150_v12 = vpop.f32.mrf.mxu0  ;;  %v1189_v10 = vadd.f32 %v1866_v11, %v1864_v9 }
  0xfc   :  { %v1190_v13 = vpop.f32.mrf.mxu1  ;;  %v760_v8 = vadd.f32 %v1149_v56, %v1043_v37 }
  0xfd   :  { %v1151_v14 = vpop.f32.mrf.mxu0 }
  0xfe   :  { %v1191_v15 = vpop.f32.mrf.mxu1  ;;  %v1152_v44 = vadd.f32 %v1151_v14, %v1150_v12  ;;  %v814_v12 = vadd.f32 %v1180_v62, %v749_v51  ;;  %v1186_v14 = vadd.f32 %v1862_v7, %v1860_v5 }
  0xff   :  { %v1153_v16 = vpop.f32.mrf.mxu0  ;;  %v1192_v58 = vadd.f32 %v1191_v15, %v1190_v13 }
 0x100   :  { %v1868_v17 = vpop.f32.mrf.mxu1 }
 0x101   :  { %v1154_v18 = vpop.f32.mrf.mxu0 }
 0x102   :  { %v1194_v19 = vpop.f32.mrf.mxu1  ;;  %v1155_v52 = vadd.f32 %v1154_v18, %v1153_v16 }
 0x103   :  { %v1212_v20 = vpop.f32.mrf.mxu0 }
 0x104   :  { %v1870_v21 = vpop.f32.mrf.mxu1  ;;  %v768_v16 = vadd.f32 %v1155_v52, %v1043_v37 }
 0x105   :  { %v1213_v22 = vpop.f32.mrf.mxu0 }
 0x106   :  { %v1872_v23 = vpop.f32.mrf.mxu1  ;;  %v1214_v18 = vadd.f32 %v1213_v22, %v1212_v20 }
 0x107   :  { %v1874_v24 = vpop.f32.mrf.mxu0  ;;  %v1254_v9 = vadd.f32 %v1872_v23, %v1870_v21 }
 0x108   :  { %v1876_v25 = vpop.f32.mrf.mxu1 }
 0x109   :  { %1946 = vst [vmem:[#allocation2_spill] sm:$0xff] %v1876_v25  ;;  %v1878_v26 = vpop.f32.mrf.mxu0  ;;  %v752_v25 = vadd.f32 %v1143_v43, %v1043_v37  ;;  %v825_v43 = vadd.f32 %v1189_v10, %v760_v8 }
 0x10a   :  { %v1880_v27 = vpop.f32.mrf.mxu1  ;;  %v1217_v22 = vadd.f32 %v1878_v26, %v1874_v24 }
 0x10b   :  { %1947 = vst [vmem:[#allocation3_spill] sm:$0xff] %v1880_v27  ;;  %v1218_v28 = vpop.f32.mrf.mxu0  ;;  %v806_v27 = vadd.f32 %v1174_v48, %v741_v42  ;;  %v817_v40 = vadd.f32 %v1183_v55, %v752_v25 }
 0x10c   :  { %v1882_v29 = vpop.f32.mrf.mxu1 }
 0x10d   :  { %v1219_v30 = vpop.f32.mrf.mxu0  ;;  %v871_v20 = vadd.f32 %v1214_v18, %v806_v27 }
 0x10e   :  { %v1259_v31 = vpop.f32.mrf.mxu1  ;;  %v1220_v2 = vadd.f32 %v1219_v30, %v1218_v28  ;;  %v822_v28 = vadd.f32 %v1186_v14, %v757_v0  ;;  %v1195_v30 = vadd.f32 %v1194_v19, %v1868_v17 }
 0x10f   :  { %v1221_v32 = vpop.f32.mrf.mxu0  ;;  %v1260_v25 = vadd.f32 %v1259_v31, %v1882_v29  ;;  %v936_v51 = vadd.f32 %v1254_v9, %v871_v20 }
 0x110   :  { %v1884_v33 = vpop.f32.mrf.mxu1  ;;  %v879_v42 = vadd.f32 %v1220_v2, %v814_v12  ;;  %v833_v15 = vadd.f32 %v1195_v30, %v768_v16  ;;  %v1952_v23 = vld [vmem:[#allocation2_spill] sm:$0xff] }
 0x111   :  { %1948 = vst [vmem:[#allocation4_spill] sm:$0xff] %v1884_v33  ;;  %v1222_v34 = vpop.f32.mrf.mxu0 }
 0x112   :  { %v1886_v36 = vpop.f32.mrf.mxu1  ;;  %v1223_v1 = vadd.f32 %v1222_v34, %v1221_v32  ;;  %v1953_v0 = vld [vmem:[#allocation3_spill] sm:$0xff] }
 0x113   :  { %1949 = vst [vmem:[#allocation5_spill] sm:$0xff] %v1886_v36  ;;  %v1224_v38 = vpop.f32.mrf.mxu0  ;;  %v765_v36 = vadd.f32 %v1152_v44, %v1043_v37  ;;  %v809_v37 = vadd.f32 %v1177_v60, %v744_v53  ;;  %v1257_v2 = vadd.f32 %v1953_v0, %v1952_v23 }
 0x114   :  { %v1891_v39 = vpop.f32.mrf.mxu1  ;;  %v882_v11 = vadd.f32 %v1223_v1, %v817_v40 }
 0x115   :  { %v1225_v41 = vpop.f32.mrf.mxu0  ;;  %v830_v57 = vadd.f32 %v1192_v58, %v765_v36  ;;  %v874_v26 = vadd.f32 %v1217_v22, %v809_v37 }
 0x116   :  { %v1265_v45 = vpop.f32.mrf.mxu1  ;;  %v1226_v59 = vadd.f32 %v1225_v41, %v1224_v38  ;;  %v944_v41 = vadd.f32 %v1260_v25, %v879_v42 }
 0x117   :  { %v1227_v47 = vpop.f32.mrf.mxu0  ;;  %v1266_v27 = vadd.f32 %v1265_v45, %v1891_v39  ;;  %v939_v12 = vadd.f32 %v1257_v2, %v874_v26 }
 0x118   :  { %v1893_v50 = vpop.f32.mrf.mxu1  ;;  %v887_v38 = vadd.f32 %v1226_v59, %v822_v28  ;;  %v1950_v29 = vld [vmem:[#allocation4_spill] sm:$0xff] }
 0x119   :  { %v1228_v54 = vpop.f32.mrf.mxu0 }
 0x11a   :  { %v1895_v33 = vpop.f32.mrf.mxu1  ;;  %v1229_v17 = vadd.f32 %v1228_v54, %v1227_v47  ;;  %v1951_v31 = vld [vmem:[#allocation5_spill] sm:$0xff]  ;;  %v952_v62 = vadd.f32 %v1266_v27, %v887_v38 }
 0x11b   :  { %v1230_v4 = vpop.f32.mrf.mxu0  ;;  %v1263_v48 = vadd.f32 %v1951_v31, %v1950_v29  ;;  %v1269_v53 = vadd.f32 %v1895_v33, %v1893_v50 }
 0x11c   :  { %v1270_v6 = vpop.f32.mrf.mxu1  ;;  %v890_v52 = vadd.f32 %v1229_v17, %v825_v43 }
 0x11d   :  { %v1231_v35 = vpop.f32.mrf.mxu0 }
 0x11e   :  { %v1232_v61 = vadd.f32 %v1231_v35, %v1230_v4  ;;  %v1271_v63 = vpop.f32.mrf.mxu1  ;;  %v947_v4 = vadd.f32 %v1263_v48, %v882_v11  ;;  %v955_v33 = vadd.f32 %v1269_v53, %v890_v52 }
 0x11f   :  { %v1233_v3 = vpop.f32.mrf.mxu0  ;;  %v1272_v5 = vadd.f32 %v1271_v63, %v1270_v6 }
 0x120   :  { %v895_v13 = vadd.f32 %v1232_v61, %v830_v57  ;;  %v1273_v7 = vpop.f32.mrf.mxu1 }
 0x121   :  { %v1234_v36 = vpop.f32.mrf.mxu0 }
 0x122   :  { %v1235_v19 = vadd.f32 %v1234_v36, %v1233_v3  ;;  %v1274_v32 = vpop.f32.mrf.mxu1  ;;  %v960_v34 = vadd.f32 %v1272_v5, %v895_v13 }
 0x123   :  { %v1275_v46 = vadd.f32 %v1274_v32, %v1273_v7 }
 0x124   :  { %v898_v44 = vadd.f32 %v1235_v19, %v833_v15  ;;  %v1306_v24 = vpop.f32.mrf.mxu0 }
 0x125   :  { %v1009_v47 = vadd.f32 %v1306_v24, %v944_v41  ;;  %v1310_v49 = vpop.f32.mrf.mxu1 }
 0x126   :  { %v1025_v54 = vadd.f32 %v1310_v49, %v960_v34  ;;  %v1000_v60 = vpop.f32.mrf.mxu0  ;;  %v963_v21 = vadd.f32 %v1275_v46, %v898_v44 }
 0x127   :  { %1033 = vst [vmem:[%s1945_s3 + $0x10] sm:$0xff] %v1009_v47  ;;  %v1001_v39 = vadd.f32 %v1000_v60, %v936_v51  ;;  %v1016_v45 = vpop.f32.mrf.mxu1 }
 0x128   :  { %1037 = vst [vmem:[%s1945_s3 + $0x30] sm:$0xff] %v1025_v54  ;;  %v1017_v55 = vadd.f32 %v1016_v45, %v952_v62  ;;  %v1307_v56 = vpop.f32.mrf.mxu0 }
 0x129   :  { %1031 = vst [vmem:[%s1945_s3] sm:$0xff] %v1001_v39  ;;  %v1012_v58 = vadd.f32 %v1307_v56, %v947_v4  ;;  %v1311_v6 = vpop.f32.mrf.mxu1 }
 0x12a   :  { %1035 = vst [vmem:[%s1945_s3 + $0x20] sm:$0xff] %v1017_v55  ;;  %v1028_v14 = vadd.f32 %v1311_v6, %v963_v21  ;;  %v1003_v16 = vpop.f32.mrf.mxu0 }
 0x12b   :  { %1034 = vst [vmem:[%s1945_s3 + $0x18] sm:$0xff] %v1012_v58  ;;  %v1004_v50 = vadd.f32 %v1003_v16, %v939_v12  ;;  %v1019_v18 = vpop.f32.mrf.mxu1 }
 0x12c   :  { %1038 = vst [vmem:[%s1945_s3 + $0x38] sm:$0xff] %v1028_v14  ;;  %v1020_v35 = vadd.f32 %v1019_v18, %v955_v33 }
 0x12d   :  { %1032 = vst [vmem:[%s1945_s3 + $0x8] sm:$0xff] %v1004_v50 }
 0x12e   :  { %1036 = vst [vmem:[%s1945_s3 + $0x28] sm:$0xff] %v1020_v35 }

</bundles_post_ra>
